<compile_context>
chip_gen: v7x
topology: tpu7x:2x2x1
jax: 0.10.0
libtpu: 0.0.40
codegen_flags: <defaults>
</compile_context>

<pallas_src>
import functools

import jax
import jax.numpy as jnp
from jax import lax
from jax.experimental import pallas as pl
from jax.experimental.pallas import tpu as pltpu


def autopad(k, p=None, d=1):
    """Same-shape padding (mirrors the PyTorch helper, scalar k only)."""
    if d > 1:
        k = d * (k - 1) + 1
    if p is None:
        p = k // 2
    return p


def _conv_bn_act_kernel(x_ref, w_ref, bias_ref, o_ref, *, act):
    # x_ref:    (K, TN)  bf16   im2col patches tile
    # w_ref:    (C2, K)  bf16   BN-scale-folded weight, grid-invariant / resident
    # bias_ref: (C2, 1)  f32    folded BN bias
    # o_ref:    (C2, TN) f32    lane-dense output tile
    y = jnp.dot(w_ref[...], x_ref[...], preferred_element_type=jnp.float32)  # MXU, f32 acc
    y = y + bias_ref[...]                                                     # fused BN bias
    if act:
        # SiLU(y) = y * sigmoid(y); reciprocal goes to the EUP slot (nearly free).
        y = y * pl.reciprocal(1.0 + jnp.exp(-y), approx=True)
    o_ref[...] = y.astype(o_ref.dtype)


def _im2col(x, k, s, p, d):
    """(B, C1, H, W) -> (B, C1*k*k, Ho*Wo) with (c1, kh, kw) channel ordering."""
    B, C1, H, W = x.shape
    if k == 1 and s == 1 and p == 0 and d == 1:
        return x.reshape(B, C1, H * W), H, W
    xp = jnp.pad(x, ((0, 0), (0, 0), (p, p), (p, p)))
    eff_k = d * (k - 1) + 1
    Ho = (H + 2 * p - eff_k) // s + 1
    Wo = (W + 2 * p - eff_k) // s + 1
    cols = []
    for kh in range(k):
        for kw in range(k):
            sl = xp[:, :,
                    kh * d: kh * d + (Ho - 1) * s + 1: s,
                    kw * d: kw * d + (Wo - 1) * s + 1: s]
            cols.append(sl)                              # (B, C1, Ho, Wo)
    patches = jnp.stack(cols, axis=2)                    # (B, C1, k*k, Ho, Wo)
    return patches.reshape(B, C1 * k * k, Ho * Wo), Ho, Wo


def _pick_spatial_tile(n_pad, K, C2):
    """Largest lane-dense tile dividing n_pad that keeps double-buffered VMEM modest."""
    budget = 12 * 1024 * 1024  # conservative: fits the v5e 16 MiB scoped-VMEM default
    for t in (2048, 1024, 512, 256, 128):
        if n_pad % t:
            continue
        x_bytes = K * t * 2 * 2        # bf16 patches tile, double-buffered
        o_bytes = C2 * t * 4 * 2       # f32 output tile, double-buffered
        w_bytes = C2 * K * 2 * 2       # bf16 weight (resident; count both buffers)
        b_bytes = C2 * 4 * 2           # f32 bias
        if x_bytes + o_bytes + w_bytes + b_bytes <= budget:
            return t
    return 128


def conv_bn_act_pallas(x, weight, gamma, beta, mean, var,
                       k=1, s=1, p=None, g=1, d=1, act=True, eps=1e-5):
    """Fused Conv2d(no bias) + BatchNorm2d(eval) + SiLU.  x: (B, C1, H, W) f32."""
    assert g == 1, "TODO(synk): grouped convolution (g > 1) not implemented"
    B, C1, H, W = x.shape
    C2 = weight.shape[0]
    pad = autopad(k, p, d)

    # im2col in bf16: halves the HBM footprint of the k*k-duplicated patch buffer.
    patches, Ho, Wo = _im2col(x.astype(jnp.bfloat16), k, s, pad, d)   # (B, K, N) bf16
    K = patches.shape[1]
    N = Ho * Wo

    # Lane-dense spatial axis: pad N up to a multiple of 128.
    LANE = 128
    Npad = ((N + LANE - 1) // LANE) * LANE
    if Npad != N:
        patches = jnp.pad(patches, ((0, 0), (0, 0), (0, Npad - N)))
    TN = _pick_spatial_tile(Npad, K, C2)

    # Fold BatchNorm (eval) into the weight (per-out-channel scale) + a bias vector.
    inv_std = lax.rsqrt(var.astype(jnp.float32) + eps)
    scale = (gamma.astype(jnp.float32) * inv_std)                         # (C2,)
    w_folded = weight.reshape(C2, K).astype(jnp.float32) * scale[:, None]
    w_bf = w_folded.astype(jnp.bfloat16)                                  # (C2, K) bf16
    bias = (beta - mean * gamma * inv_std).reshape(C2, 1).astype(jnp.float32)

    grid = (B, Npad // TN)
    kernel = functools.partial(_conv_bn_act_kernel, act=act)

    out = pl.pallas_call(
        kernel,
        out_shape=jax.ShapeDtypeStruct((B, C2, Npad), jnp.float32),
        grid_spec=pltpu.PrefetchScalarGridSpec(
            num_scalar_prefetch=0,
            grid=grid,
            in_specs=[
                pl.BlockSpec((None, K, TN), lambda b, n: (b, 0, n)),  # patches tile (batch squeezed)
                pl.BlockSpec((C2, K), lambda b, n: (0, 0)),           # weight: grid-invariant
                pl.BlockSpec((C2, 1), lambda b, n: (0, 0)),           # BN bias: grid-invariant
            ],
            out_specs=pl.BlockSpec((None, C2, TN), lambda b, n: (b, 0, n)),
        ),
        compiler_params=pltpu.CompilerParams(
            dimension_semantics=("parallel", "parallel")),
    )(patches, w_bf, bias)

    return out[:, :, :N].reshape(B, C2, Ho, Wo)


def _reference(x, w, gamma, beta, mean, var, k, s, p, d, act=True, eps=1e-5):
    """Pure-JAX reference matching the PyTorch Conv.forward (eval-mode BN)."""
    pad = autopad(k, p, d)
    y = lax.conv_general_dilated(
        x, w, window_strides=(s, s), padding=((pad, pad), (pad, pad)),
        rhs_dilation=(d, d), dimension_numbers=("NCHW", "OIHW", "NCHW"),
        precision=lax.Precision.HIGHEST)
    sc = (gamma * lax.rsqrt(var + eps))[None, :, None, None]
    y = (y - mean[None, :, None, None]) * sc + beta[None, :, None, None]
    return y * jax.nn.sigmoid(y) if act else y


if __name__ == "__main__":
    key = jax.random.PRNGKey(0)

    def make_params(keys, c1, c2, k):
        kw_, kg, kb, km, kv = keys
        fan_in = c1 * k * k
        w = jax.random.normal(kw_, (c2, c1, k, k), jnp.float32) / jnp.sqrt(fan_in)
        gamma = 1.0 + 0.1 * jax.random.normal(kg, (c2,), jnp.float32)
        beta = 0.1 * jax.random.normal(kb, (c2,), jnp.float32)
        mean = 0.1 * jax.random.normal(km, (c2,), jnp.float32)
        var = 0.5 + 0.5 * jnp.abs(jax.random.normal(kv, (c2,), jnp.float32))
        return w, gamma, beta, mean, var

    # Case 1: module defaults (k=1, s=1) -> pure channel-matmul path, N=256 lane-dense.
    B, C1, C2, H, W = 2, 8, 16, 16, 16
    ks = jax.random.split(key, 6)
    x = jax.random.normal(ks[0], (B, C1, H, W), jnp.float32)
    w, gamma, beta, mean, var = make_params(ks[1:6], C1, C2, 1)
    out1 = jax.block_until_ready(
        conv_bn_act_pallas(x, w, gamma, beta, mean, var, k=1, s=1))
    ref1 = _reference(x, w, gamma, beta, mean, var, 1, 1, None, 1)
    assert out1.shape == ref1.shape
    assert jnp.allclose(out1, ref1, rtol=3e-2, atol=3e-2), "k=1 mismatch vs reference"

    # Case 2: 3x3 stride-2 conv -> im2col path (K = C1*9), padded/strided windows.
    ks2 = jax.random.split(jax.random.PRNGKey(1), 6)
    x2 = jax.random.normal(ks2[0], (B, C1, H, W), jnp.float32)
    w2, g2, b2, m2, v2 = make_params(ks2[1:6], C1, C2, 3)
    out2 = jax.block_until_ready(
        conv_bn_act_pallas(x2, w2, g2, b2, m2, v2, k=3, s=2))
    ref2 = _reference(x2, w2, g2, b2, m2, v2, 3, 2, None, 1)
    assert out2.shape == ref2.shape
    assert jnp.allclose(out2, ref2, rtol=3e-2, atol=3e-2), "k=3/s=2 mismatch vs reference"

    # Case 3: act=False path (Identity activation).
    out3 = jax.block_until_ready(
        conv_bn_act_pallas(x, w, gamma, beta, mean, var, k=1, s=1, act=False))
    ref3 = _reference(x, w, gamma, beta, mean, var, 1, 1, None, 1, act=False)
    assert jnp.allclose(out3, ref3, rtol=3e-2, atol=3e-2), "act=False mismatch vs reference"

    print("KERNEL_OK")
</pallas_src>

<mosaic_0001>
module attributes {stable_mosaic.version = 11 : i64} {
  func.func @_conv_bn_act_kernel(%arg0: i32, %arg1: i32, %arg2: memref<1x8x256xbf16, #tpu.memory_space<vmem>>, %arg3: memref<16x8xbf16, #tpu.memory_space<vmem>>, %arg4: memref<16x1xf32, #tpu.memory_space<vmem>>, %arg5: memref<1x16x256xf32, #tpu.memory_space<vmem>>) attributes {dimension_semantics = [#tpu.dimension_semantics<parallel>, #tpu.dimension_semantics<parallel>], iteration_bounds = array<i64: 2, 1>, scalar_prefetch = 0 : i64, scratch_operands = 0 : i64, tpu.core_type = #tpu.core_type<tc>, window_params = [{transform_indices = @transform_0, window_bounds = array<i64: 1, 8, 256>}, {pipeline_mode = #tpu.pipeline_mode<synchronous>, transform_indices = @transform_1, window_bounds = array<i64: 16, 8>}, {pipeline_mode = #tpu.pipeline_mode<synchronous>, transform_indices = @transform_2, window_bounds = array<i64: 16, 1>}, {transform_indices = @transform_3, window_bounds = array<i64: 1, 16, 256>}]} {
    %c0 = arith.constant 0 : index
    %c0_0 = arith.constant 0 : index
    %0 = vector.load %arg3[%c0, %c0_0] : memref<16x8xbf16, #tpu.memory_space<vmem>>, vector<16x8xbf16>
    %c0_1 = arith.constant 0 : index
    %c0_2 = arith.constant 0 : index
    %c0_3 = arith.constant 0 : index
    %1 = vector.load %arg2[%c0_1, %c0_2, %c0_3] : memref<1x8x256xbf16, #tpu.memory_space<vmem>>, vector<1x8x256xbf16>
    %2 = vector.shape_cast %1 : vector<1x8x256xbf16> to vector<8x256xbf16>
    %cst = arith.constant dense<0.000000e+00> : vector<16x256xf32>
    %3 = tpu.matmul %0, %2, %cst {dimension_numbers = #tpu.dot_dimension_numbers<[1], [0], [0], [1], [0, 0, 1, 1], [], []>} : vector<16x8xbf16>, vector<8x256xbf16>, vector<16x256xf32> -> vector<16x256xf32>
    %c0_4 = arith.constant 0 : index
    %c0_5 = arith.constant 0 : index
    %4 = vector.load %arg4[%c0_4, %c0_5] : memref<16x1xf32, #tpu.memory_space<vmem>>, vector<16x1xf32>
    %5 = vector.broadcast %4 : vector<16x1xf32> to vector<16x256xf32>
    %6 = arith.addf %3, %5 : vector<16x256xf32>
    %cst_6 = arith.constant 0.000000e+00 : f32
    %7 = vector.broadcast %cst_6 : f32 to vector<16x256xf32>
    %8 = arith.subf %7, %6 : vector<16x256xf32>
    %9 = math.exp %8 : vector<16x256xf32>
    %cst_7 = arith.constant 1.000000e+00 : f32
    %10 = vector.broadcast %cst_7 : f32 to vector<16x256xf32>
    %11 = arith.addf %10, %9 : vector<16x256xf32>
    %12 = tpu.reciprocal %11 {approx = true} : vector<16x256xf32> -> vector<16x256xf32>
    %13 = arith.mulf %6, %12 : vector<16x256xf32>
    %c0_8 = arith.constant 0 : index
    %c0_9 = arith.constant 0 : index
    %c0_10 = arith.constant 0 : index
    %14 = vector.load %arg5[%c0_8, %c0_9, %c0_10] : memref<1x16x256xf32, #tpu.memory_space<vmem>>, vector<1x16x256xf32>
    %15 = vector.shape_cast %14 : vector<1x16x256xf32> to vector<16x256xf32>
    %16 = vector.shape_cast %13 : vector<16x256xf32> to vector<1x16x256xf32>
    tpu.vector_store %arg5[%c0_8, %c0_9, %c0_10], %16 {strides = array<i32>} : memref<1x16x256xf32, #tpu.memory_space<vmem>>, vector<1x16x256xf32>,
    return
  }
  func.func @transform_0(%arg0: i32, %arg1: i32) -> (i32, i32, i32) {
    %c0_i32 = arith.constant 0 : i32
    %c0_i32_0 = arith.constant 0 : i32
    return %arg0, %c0_i32, %arg1 : i32, i32, i32
  }
  func.func @transform_1(%arg0: i32, %arg1: i32) -> (i32, i32) {
    %c0_i32 = arith.constant 0 : i32
    %c0_i32_0 = arith.constant 0 : i32
    %c0_i32_1 = arith.constant 0 : i32
    return %c0_i32, %c0_i32_0 : i32, i32
  }
  func.func @transform_2(%arg0: i32, %arg1: i32) -> (i32, i32) {
    %c0_i32 = arith.constant 0 : i32
    %c0_i32_0 = arith.constant 0 : i32
    %c0_i32_1 = arith.constant 0 : i32
    return %c0_i32, %c0_i32_0 : i32, i32
  }
  func.func @transform_3(%arg0: i32, %arg1: i32) -> (i32, i32, i32) {
    %c0_i32 = arith.constant 0 : i32
    %c0_i32_0 = arith.constant 0 : i32
    return %arg0, %c0_i32, %arg1 : i32, i32, i32
  }
}

</mosaic_0001>

<bundles_post_ra>
// kernel: tpu_custom_call.1
= control target key start
LH: loop header
LB: loop body
LE: loop exit
PB: predicated region body
PF: predicated region fallthrough
CT: control target
= control target key end

     0   :  { %8 = vsyncpa [#allocation3], 0  ;;  %s729_s0 = inlined_call_operand.vmem [shape: bf16[2,8,256], index: 0, kind: input, shape index: {}]   ;;  %s730_s1 = inlined_call_operand.vmem [shape: bf16[16,8], index: 1, kind: input, shape index: {}]   ;;  %s731_s2 = inlined_call_operand.vmem [shape: f32[16,1], index: 2, kind: input, shape index: {}]   ;;  %s732_s3 = inlined_call_operand.hbm [shape: f32[2,16,256], index: 3, kind: output, shape index: {}]  }
   0x1   :  { %10 = vsyncpa [#allocation3 + $0x1], 0  ;;  %s605_s12 = smov 0   ;;  %s607_s13 = smov 0  }
   0x2   :  { %s609_s14 = smov 0   ;;  %s611_s15 = smov 0  }
   0x3   :  { %s613_s16 = smov 0   ;;  %s615_s17 = smov 0  }
   0x4 LB: > { %s403_s18 = sadd.s32 4294967295, %s579_s17   ;;  %s404_s19 = sadd.s32 4294967294, %s579_s17   ;;  %s579_s17 = sphi %s615_s17, %s16_s17   ;;  %s575_s16 = sphi %s613_s16, %s739_s16   ;;  %s571_s15 = sphi %s611_s15, %s738_s15   ;;  %s567_s14 = sphi %s609_s14, %s737_s14   ;;  %s563_s13 = sphi %s607_s13, %s736_s13   ;;  %s559_s12 = sphi %s605_s12, %s735_s12  }
   0x5   : > { %s28_s20 = sadd.s32 1, %s575_s16  ;;  %s107_s21 = sadd.s32 1, %s567_s14 }
   0x6   : > { %p30_p0 = scmp.ge.s32.totalorder %s28_s20, 2  ;;  %p117_p1 = scmp.ne.s32.totalorder %s567_s14, %s563_s13 }
   0x7   : > { %p118_p2 = scmp.eq.s32.totalorder %s403_s18, 1  ;;  %p123_p3 = scmp.ne.s32.totalorder %s563_s13, %s559_s12 }
   0x8   : > { %s741_s20 = smov (%p30_p0, %s28_s20), 0  ;;  %p124_p5 = scmp.eq.s32.totalorder %s404_s19, 1 }
   0x9   : > { %p645_p4 = por %p118_p2, %p117_p1  ;;  %s102_s23 = ssub.s32 %s575_s16, %s741_s20 }
   0xa   : > { %p407_p6 = scmp.ge.s32.totalorder %s579_s17, 1  ;;  %p105_p7 = scmp.eq.s32.totalorder %s102_s23, 0 }
   0xb   : > { %p652_p8 = por %p124_p5, %p123_p3  ;;  %p161_p9 = scmp.lt.s32.totalorder %s579_s17, 3 }
   0xc   : > { %s658_s25 = scalar_select %p105_p7, %s567_s14, %s107_s21  }
   0xd   : > { %p162_p10 = pnand %p407_p6, %p161_p9 }
   0xe   : > { %p190_p11 = scmp.lt.s32.totalorder (!%p162_p10), %s571_s15, 1  ;;  %v581_v0 = vmov (!%p162_p10), 0   ;;  %v204_v1 = vld [vmem:[%s731_s2] sm:$0xff] (!%p162_p10)  ;;  %v205_v2 = vld [vmem:[%s731_s2 + $0x8] sm:$0xff] (!%p162_p10)  ;;  %vm230_vm0 = vcmask (!%p162_p10), 1043456   ;;  %vm226_vm1 = vcmask (!%p162_p10), 64512  }
   0xf   : > { %165 = sbr.rel (%p162_p10) target bundleno = 295 (0x127), region = 32  ;;  %269 = vmatprep.mubr.bf16.mxu0 (!%p162_p10), %v581_v0  ;;  %481 = vset.pattern.permute.xlu0 (!%p162_p10), %v581_v0  ;;  %v484_v7 = vld [vmem:[%s730_s1] sm:$0xff] (!%p162_p10)   ;;  %s186_s10 = sand.u32 (!%p162_p10), 1, %s563_s13  }
  0x10   : > { %208 = vperm.xlu0 (!%p162_p10), %481, %v204_v1   ;;  %s408_s11 = sshll.u32 (!%p162_p10), %s186_s10, 5  ;;  %s422_s21 = sshll.u32 (!%p162_p10), %s571_s15, 9 }
  0x11   : > { %s188_s18 = scalar_lea.vmem (!%p162_p10), [#allocation2], %s408_s11  ;;  %s681_s27 = scalar_lea.hbm (!%p162_p10), %s732_s3, %s422_s21 }
  0x12   : > { %s324_s19 = sshll.u32 (!%p162_p10), %s188_s18, 4  ;;  %s582_s29 = smov (!%p162_p10), [#allocation2]   ;;  %s676_s19 = int_to_ptr.vmem [resolvable:$true] %s324_s19 }
  0x13   : > { %s505_s30 = sshll.u32 (!%p162_p10), %s582_s29, 4  ;;  %s506_s30 = int_to_ptr.vmem [resolvable:$false] %s505_s30 }
  0x14   : > { %213 = vperm.xlu0 (!%p162_p10), %481, %v205_v2   ;;  %p508_p1 = scmp.lt.s32.totalorder (!%p162_p10), %s676_s19, %s506_s30 }
  0x16   : > { %s191_s28 = scalar_select %p190_p11, %s571_s15, 1 }
  0x17   : > { %s683_s15 = scalar_lea.sflag [#allocation3], %s186_s10 }
  0x18   : > { %s421_s4 = sshll.u32 %s191_s28, 3  ;;  %s501_s28 = scalar_lea.vmem %s676_s19, 512 }
  0x19   : > { %s197_s7 = scalar_lea.vmem %s729_s0, %s421_s4  ;;  %p502_p12 = scmp.ne.s32.totalorder %s676_s19, %s501_s28 }
  0x1a   : > { %v203_v3 = vld [vmem:[%s197_s7] sm:$0xff]  ;;  %s507_s4 = scalar_lea.vmem %s506_s30, 1024 }
  0x1b   : > { %v413_v4 = vcombine.high %v203_v3, %v203_v3  ;;  %v412_v5 = vcombine.low %v203_v3, %v203_v3  ;;  %p503_p13 = pnand %p502_p12, %p645_p4  ;;  %p509_p2 = scmp.lt.s32.totalorder %s507_s4, %s501_s28 }
  0x1d   : > { %414 = vmatprep.subr.msk.bf16.mxu0 %vm230_vm0, %v413_v4  ;;  %v232_v6 = vsel %vm230_vm0, %v412_v5, 0  ;;  %p504_p0 = pneg %p503_p13  ;;  %p510_p3 = por %p509_p2, %p508_p1 }
  0x1e   : > { %238 = vmatpush1.bf16.msra.mxu0 %v232_v6 }
  0x1f   : > { %p511_p5 = pnand %p510_p3, %p504_p0 }
  0x21   : > { %415 = vmatmul.mubr.msk.bf16.vlgmr.msra.gmra.mrb[0].mxu0 %vm226_vm1, %v484_v7 }
  0x8f   : > { %v209_v8 = vpop.permute.xlu0 %208 }
  0x93   : > { %v214_v12 = vpop.permute.xlu0 %213 }
  0xf4   : > { %v271_v9 = vpop.f32.mrb[0].mxu0 }
  0xf5   : > { %v272_v10 = vadd.f32 %v271_v9, %v209_v8  ;;  %v273_v11 = vpop.f32.mrb[1].mxu0 }
  0xf6   : > { %v274_v13 = vadd.f32 %v273_v11, %v209_v8  ;;  %v275_v14 = vpop.f32.mrb[2].mxu0 }
  0xf7   : > { %v280_v15 = vsub.f32 0.0, %v272_v10  ;;  %v276_v16 = vadd.f32 %v275_v14, %v214_v12  ;;  %v277_v17 = vpop.f32.mrb[3].mxu0 }
  0xf8   : > { %v281_v18 = vsub.f32 0.0, %v274_v13  ;;  %v278_v19 = vadd.f32 %v277_v17, %v214_v12 }
  0xf9   : > { %v284_v20 = vmul.f32 1.442695, %v280_v15  ;;  %v282_v21 = vsub.f32 0.0, %v276_v16 }
  0xfa   : > { %v286_v22 = vmul.f32 1.442695, %v281_v18  ;;  %v283_v23 = vsub.f32 0.0, %v278_v19 }
  0xfb   : > { %485 = vpow2.f32 %v284_v20  ;;  %v288_v24 = vmul.f32 1.442695, %v282_v21 }
  0xfc   : > { %487 = vpow2.f32 %v286_v22  ;;  %v290_v25 = vmul.f32 1.442695, %v283_v23 }
  0xfd   : > { %489 = vpow2.f32 %v288_v24 }
  0xfe   : > { %491 = vpow2.f32 %v290_v25 }
 0x105   : > { %v486_v26 = vpop.eup %485 }
 0x106   : > { %v488_v27 = vpop.eup %487  ;;  %v292_v28 = vadd.f32 1.0, %v486_v26 }
 0x107   : > { %v490_v29 = vpop.eup %489  ;;  %v293_v30 = vadd.f32 1.0, %v488_v27 }
 0x108   : > { %v492_v31 = vpop.eup %491  ;;  %493 = vrcp.f32 %v292_v28  ;;  %v294_v32 = vadd.f32 1.0, %v490_v29 }
 0x109   : > { %495 = vrcp.f32 %v293_v30  ;;  %v295_v33 = vadd.f32 1.0, %v492_v31 }
 0x10a   : > { %497 = vrcp.f32 %v294_v32 }
 0x10b   : > { %499 = vrcp.f32 %v295_v33 }
 0x112   : > { %v494_v34 = vpop.eup %493 }
 0x113   : > { %v496_v35 = vpop.eup %495  ;;  %v300_v36 = vmul.f32 %v494_v34, %v272_v10 }
 0x114   : > { %v498_v37 = vpop.eup %497  ;;  %v301_v38 = vmul.f32 %v496_v35, %v274_v13 }
 0x115   : > { %v500_v39 = vpop.eup %499  ;;  %304 = vst [vmem:[%s188_s18] sm:$0xff] %v300_v36  ;;  %v302_v40 = vmul.f32 %v498_v37, %v276_v16 }
 0x116   : > { %305 = vst [vmem:[%s188_s18 + $0x8] sm:$0xff] %v301_v38  ;;  %v303_v41 = vmul.f32 %v500_v39, %v278_v19 }
 0x117   : > { %306 = vst [vmem:[%s188_s18 + $0x10] sm:$0xff] %v302_v40 }
 0x118   : > { %307 = vst [vmem:[%s188_s18 + $0x18] sm:$0xff] %v303_v41 }
 0x119   : > { %514 = shalt.err (!%p511_p5)
}
 0x11a   : > { %s515_s5 = scalar_lea.hbm %s681_s27, 512  ;;  %s519_s8 = scalar_lea.hbm %s732_s3, 1024 }
 0x11b   : > { %p516_p6 = scmp.ne.s32.totalorder %s681_s27, %s515_s5  ;;  %p520_p10 = scmp.lt.u32.totalorder %s681_s27, %s732_s3 }
 0x11c   : > { %p521_p11 = scmp.lt.u32.totalorder %s519_s8, %s515_s5  ;;  %p523_p13 = scmp.lt.u32.totalorder %s515_s5, %s681_s27 }
 0x11d   : > { %p517_p7 = pnand %p516_p6, %p645_p4 }
 0x11e   : > { %p522_p12 = por %p521_p11, %p520_p10 }
 0x11f   : > { %p518_p9 = pneg %p517_p7 }
 0x120   : > { %p524_p0 = por %p523_p13, %p522_p12 }
 0x122   : > { %p525_p1 = pnand %p524_p0, %p518_p9 }
 0x124   : > { %528 = shalt.err (!%p525_p1)
}
 0x125   : > { %s583_s11 = smov 256   ;;  %s584_s18 = smov 16  }
 0x126   : > { %423 = dma.vmem_to_hbm [thread:$0]  (%p645_p4), %s676_s19, 512, %s681_s27, %s683_s15, %s583_s11, %s583_s11, %s584_s18  }
 0x127 PF: > { %p429_p2 = scmp.ge.s32.totalorder %s579_s17, 2  ;;  %s339_s21 = sand.u32 1, %s559_s12  }
 0x128   : > { %s340_s23 = scalar_lea.sflag [#allocation3], %s339_s21 }
 0x129   : > { %p426_p3 = pnand %p429_p2, %p652_p8 }
 0x12b   : > { %554 = dma.done.wait (!%p426_p3), %s340_s23, 512  }
 0x12c   : > { %556 = vsyncadd (!%p426_p3), %s340_s23, 4294966784  ;;  %s16_s17 = sadd.s32 1, %s579_s17   ;;  %s735_s12 = smov %s563_s13 }
 0x12d   : > { %p13_p5 = scmp.ge.s32.totalorder %s16_s17, 4   ;;  %s736_s13 = smov %s567_s14 }
 0x12e   : > { %s737_s14 = smov %s658_s25  ;;  %s738_s15 = smov %s575_s16 }
 0x12f   : > { %s739_s16 = smov %s741_s20  ;;  %15 = sbr.rel (!%p13_p5) target bundleno = 4 (0x4), region = 67 }
 0x136   :  { %345 = vsyncpa [#allocation3], 1 }
 0x137   :  { %347 = vsyncpa [#allocation3 + $0x1], 1 }

</bundles_post_ra>
